<compile_context>
chip_gen: v5e
topology: v5e:2x2
jax: 0.10.0
libtpu: 0.0.40
codegen_flags: <defaults>
</compile_context>

<pallas_src>
import functools

import jax
import jax.numpy as jnp
from jax.experimental import pallas as pl
from jax.experimental.pallas import tpu as pltpu

_LANES = 128
_SUBLANES = 8
# 2048 rows x 128 lanes x 4 B = 1 MiB per mask-tile buffer (2 MiB double-buffered).
_MAX_TILE_ROWS = 2048


def _round_up(x, m):
    return -(-x // m) * m


def _fused_loss_kernel(targets_ref, logits_ref, weight_ref, mask_ref, out_ref,
                       *, batch, n_mask_real):
    """Grid axis = mask tiles. out_ref (1,1) is the resident accumulator."""
    i = pl.program_id(0)
    n_tiles = pl.num_programs(0)

    @pl.when(i == 0)
    def _init():
        out_ref[...] = jnp.zeros_like(out_ref)

    # ---- mask partial: sum of tanh over this tile (EUP + XLU slots) --------
    m = mask_ref[...].astype(jnp.float32)                       # (tile_rows, 128)
    out_ref[...] += jnp.sum(jnp.tanh(m), keepdims=True)         # (1, 1)

    # ---- last step: weighted cross-entropy + finalize -----------------------
    @pl.when(i == n_tiles - 1)
    def _finalize():
        logits = logits_ref[...].astype(jnp.float32)            # (B, C)
        tgt = targets_ref[...]                                  # (B, 1) int32
        w = weight_ref[...].astype(jnp.float32)                 # (1, C)
        B, C = logits.shape

        col = jax.lax.broadcasted_iota(jnp.int32, (B, C), 1)
        onehot = (col == tgt).astype(jnp.float32)               # (B, C)
        wh = w * onehot                                         # w[y_i] at class y_i

        # numerically-stable logsumexp over classes
        mx = jnp.max(logits, axis=1, keepdims=True)             # (B, 1)
        lse = mx + jnp.log(jnp.sum(jnp.exp(logits - mx), axis=1, keepdims=True))

        # single merged lane reduction: sum_i w[y_i] * (lse_i - logits_i[y_i])
        ce_sum = jnp.sum(wh * (lse - logits), keepdims=True)    # (1, 1)

        # fold the (tanh+1)/2 affine back in; padded zeros contributed 0.
        mask_l1 = 0.5 * out_ref[...] + (0.5 * n_mask_real)      # (1, 1)

        out_ref[...] = (ce_sum + 0.001 * mask_l1) * (1.0 / batch)


def combine_lossmask(pred_logits, targets, mask, per_cls_weights):
    """JAX/Pallas equivalent of CombineLossmask.forward (single fused kernel)."""
    B, C = pred_logits.shape

    tgt2d = targets.astype(jnp.int32).reshape(B, 1)
    weight = jnp.asarray(per_cls_weights).reshape(1, C)         # dtype kept; cast in-kernel

    # Flatten mask to a lane-dense 2D slab; zero-pad to (tile_rows*k, 128).
    # Padding is exact: tanh(0) = 0 and the +0.5 offset uses n_real only.
    mask_flat = mask.reshape(-1)                                # dtype kept; cast in-kernel
    n_real = mask_flat.shape[0]
    rows = _round_up(pl.cdiv(n_real, _LANES), _SUBLANES)
    tile_rows = min(_MAX_TILE_ROWS, rows)
    padded_rows = _round_up(rows, tile_rows)
    n_padded = padded_rows * _LANES
    if n_padded != n_real:
        mask_flat = jnp.pad(mask_flat, (0, n_padded - n_real))
    mask2d = mask_flat.reshape(padded_rows, _LANES)
    n_tiles = padded_rows // tile_rows

    cost = pl.CostEstimate(
        flops=6 * B * C + 2 * n_padded,
        transcendentals=B * C + n_padded,
        bytes_accessed=int(pred_logits.size * pred_logits.dtype.itemsize
                           + tgt2d.size * 4
                           + weight.size * weight.dtype.itemsize
                           + n_padded * mask2d.dtype.itemsize
                           + 4),
    )

    out = pl.pallas_call(
        functools.partial(_fused_loss_kernel, batch=B, n_mask_real=n_real),
        out_shape=jax.ShapeDtypeStruct((1, 1), jnp.float32),
        grid=(n_tiles,),
        in_specs=[
            pl.BlockSpec((B, 1), lambda i: (0, 0)),              # targets (resident)
            pl.BlockSpec((B, C), lambda i: (0, 0)),              # logits  (resident)
            pl.BlockSpec((1, C), lambda i: (0, 0)),              # weights (resident)
            pl.BlockSpec((tile_rows, _LANES), lambda i: (i, 0)),  # mask tiles (pipelined)
        ],
        out_specs=pl.BlockSpec((1, 1), lambda i: (0, 0)),         # resident accumulator
        compiler_params=pltpu.CompilerParams(
            dimension_semantics=("arbitrary",)),
        cost_estimate=cost,
    )(tgt2d, pred_logits, weight, mask2d)

    return out[0, 0]


def _reference(pred_logits, targets, mask, per_cls_weights):
    """Pure-JAX reference mirroring the PyTorch module, for sanity checking."""
    logits = pred_logits.astype(jnp.float32)
    B, C = logits.shape
    w = jnp.asarray(per_cls_weights, dtype=jnp.float32)
    logp = jax.nn.log_softmax(logits, axis=1)
    nll = -jnp.take_along_axis(logp, targets.reshape(B, 1).astype(jnp.int32), axis=1)[:, 0]
    ce = w[targets] * nll
    raw = (jnp.tanh(mask.astype(jnp.float32)) + 1.0) / 2.0
    loss2 = jnp.sum(jnp.abs(raw)) * 0.001
    return (jnp.sum(ce) + loss2) / B


if __name__ == "__main__":
    key = jax.random.PRNGKey(0)
    k1, k2, k3, k4 = jax.random.split(key, 4)

    B, C = 8, 16                       # batch, num_classes
    mask_shape = (2, 4, 15, 15)        # NCHW-style mask (1800 elems, NOT lane-aligned)

    pred_logits = jax.random.normal(k1, (B, C), dtype=jnp.float32)
    targets = jax.random.randint(k2, (B,), 0, C, dtype=jnp.int32)
    mask = jax.random.normal(k3, mask_shape, dtype=jnp.float32)
    per_cls_weights = jax.random.uniform(k4, (C,), dtype=jnp.float32, minval=0.5, maxval=1.5)

    out = combine_lossmask(pred_logits, targets, mask, per_cls_weights)
    out = jax.block_until_ready(out)

    ref = _reference(pred_logits, targets, mask, per_cls_weights)
    assert jnp.allclose(out, ref, rtol=1e-5, atol=1e-5), (out, ref)

    print("KERNEL_OK")
</pallas_src>

<mosaic_0001>
module attributes {stable_mosaic.version = 11 : i64} {
  func.func @_fused_loss_kernel(%arg0: i32, %arg1: memref<8x1xi32, #tpu.memory_space<vmem>>, %arg2: memref<8x16xf32, #tpu.memory_space<vmem>>, %arg3: memref<1x16xf32, #tpu.memory_space<vmem>>, %arg4: memref<16x128xf32, #tpu.memory_space<vmem>>, %arg5: memref<1x1xf32, #tpu.memory_space<vmem>>) attributes {dimension_semantics = [#tpu.dimension_semantics<arbitrary>], iteration_bounds = array<i64: 1>, scalar_prefetch = 0 : i64, scratch_operands = 0 : i64, tpu.core_type = #tpu.core_type<tc>, window_params = [{pipeline_mode = #tpu.pipeline_mode<synchronous>, transform_indices = @transform_0, window_bounds = array<i64: 8, 1>}, {pipeline_mode = #tpu.pipeline_mode<synchronous>, transform_indices = @transform_1, window_bounds = array<i64: 8, 16>}, {pipeline_mode = #tpu.pipeline_mode<synchronous>, transform_indices = @transform_2, window_bounds = array<i64: 1, 16>}, {transform_indices = @transform_3, window_bounds = array<i64: 16, 128>}, {pipeline_mode = #tpu.pipeline_mode<synchronous>, transform_indices = @transform_4, window_bounds = array<i64: 1, 1>}]} {
    %c0_i32 = arith.constant 0 : i32
    %0 = arith.cmpi eq, %arg0, %c0_i32 : i32
    %1 = arith.extui %0 : i1 to i32
    %c0_i32_0 = arith.constant 0 : i32
    %2 = arith.cmpi ne, %1, %c0_i32_0 : i32
    scf.if %2 {
      %cst_8 = arith.constant 0.000000e+00 : f32
      %16 = vector.broadcast %cst_8 : f32 to vector<1x1xf32>
      %c0_9 = arith.constant 0 : index
      %c0_10 = arith.constant 0 : index
      %17 = vector.load %arg5[%c0_9, %c0_10] : memref<1x1xf32, #tpu.memory_space<vmem>>, vector<1x1xf32>
      tpu.vector_store %arg5[%c0_9, %c0_10], %16 {strides = array<i32>} : memref<1x1xf32, #tpu.memory_space<vmem>>, vector<1x1xf32>,
    } else {
    }
    %c0 = arith.constant 0 : index
    %c0_1 = arith.constant 0 : index
    %3 = vector.load %arg4[%c0, %c0_1] : memref<16x128xf32, #tpu.memory_space<vmem>>, vector<16x128xf32>
    %c0_2 = arith.constant 0 : index
    %c0_3 = arith.constant 0 : index
    %4 = vector.load %arg5[%c0_2, %c0_3] : memref<1x1xf32, #tpu.memory_space<vmem>>, vector<1x1xf32>
    %5 = math.tanh %3 : vector<16x128xf32>
    %6 = vector.shape_cast %5 : vector<16x128xf32> to vector<1x16x128xf32>
    %cst = arith.constant dense<0.000000e+00> : vector<1xf32>
    %7 = vector.multi_reduction <add>, %6, %cst [1, 2] : vector<1x16x128xf32> to vector<1xf32>
    %8 = vector.shape_cast %7 : vector<1xf32> to vector<1x1x1xf32>
    %9 = vector.extract %8[0, 0, 0] : f32 from vector<1x1x1xf32>
    %10 = vector.broadcast %9 : f32 to vector<1x1xf32>
    %11 = arith.addf %4, %10 : vector<1x1xf32>
    %c0_4 = arith.constant 0 : index
    %c0_5 = arith.constant 0 : index
    %12 = vector.load %arg5[%c0_4, %c0_5] : memref<1x1xf32, #tpu.memory_space<vmem>>, vector<1x1xf32>
    tpu.vector_store %arg5[%c0_4, %c0_5], %11 {strides = array<i32>} : memref<1x1xf32, #tpu.memory_space<vmem>>, vector<1x1xf32>,
    %c0_i32_6 = arith.constant 0 : i32
    %13 = arith.cmpi eq, %arg0, %c0_i32_6 : i32
    %14 = arith.extui %13 : i1 to i32
    %c0_i32_7 = arith.constant 0 : i32
    %15 = arith.cmpi ne, %14, %c0_i32_7 : i32
    scf.if %15 {
      %c0_8 = arith.constant 0 : index
      %c0_9 = arith.constant 0 : index
      %16 = vector.load %arg2[%c0_8, %c0_9] : memref<8x16xf32, #tpu.memory_space<vmem>>, vector<8x16xf32>
      %c0_10 = arith.constant 0 : index
      %c0_11 = arith.constant 0 : index
      %17 = vector.load %arg1[%c0_10, %c0_11] : memref<8x1xi32, #tpu.memory_space<vmem>>, vector<8x1xi32>
      %c0_12 = arith.constant 0 : index
      %c0_13 = arith.constant 0 : index
      %18 = vector.load %arg3[%c0_12, %c0_13] : memref<1x16xf32, #tpu.memory_space<vmem>>, vector<1x16xf32>
      %19 = tpu.iota {dimensions = array<i32: 1>} : vector<8x16xi32>
      %20 = vector.broadcast %17 : vector<8x1xi32> to vector<8x16xi32>
      %21 = arith.cmpi eq, %19, %20 : vector<8x16xi32>
      %22 = arith.extui %21 : vector<8x16xi1> to vector<8x16xi32>
      %23 = arith.sitofp %22 : vector<8x16xi32> to vector<8x16xf32>
      %24 = vector.broadcast %18 : vector<1x16xf32> to vector<8x16xf32>
      %25 = arith.mulf %24, %23 : vector<8x16xf32>
      %cst_14 = arith.constant dense<0xFF800000> : vector<8xf32>
      %26 = vector.multi_reduction <maximumf>, %16, %cst_14 [1] : vector<8x16xf32> to vector<8xf32>
      %27 = vector.shape_cast %26 : vector<8xf32> to vector<8x1xf32>
      %28 = vector.broadcast %27 : vector<8x1xf32> to vector<8x16xf32>
      %29 = arith.subf %16, %28 : vector<8x16xf32>
      %30 = math.exp %29 : vector<8x16xf32>
      %cst_15 = arith.constant dense<0.000000e+00> : vector<8xf32>
      %31 = vector.multi_reduction <add>, %30, %cst_15 [1] : vector<8x16xf32> to vector<8xf32>
      %32 = vector.shape_cast %31 : vector<8xf32> to vector<8x1xf32>
      %33 = math.log %32 : vector<8x1xf32>
      %34 = arith.addf %27, %33 : vector<8x1xf32>
      %35 = vector.broadcast %34 : vector<8x1xf32> to vector<8x16xf32>
      %36 = arith.subf %35, %16 : vector<8x16xf32>
      %37 = arith.mulf %25, %36 : vector<8x16xf32>
      %38 = vector.shape_cast %37 : vector<8x16xf32> to vector<1x8x16xf32>
      %cst_16 = arith.constant dense<0.000000e+00> : vector<1xf32>
      %39 = vector.multi_reduction <add>, %38, %cst_16 [1, 2] : vector<1x8x16xf32> to vector<1xf32>
      %40 = vector.shape_cast %39 : vector<1xf32> to vector<1x1x1xf32>
      %41 = vector.extract %40[0, 0, 0] : f32 from vector<1x1x1xf32>
      %42 = vector.broadcast %41 : f32 to vector<1x1xf32>
      %c0_17 = arith.constant 0 : index
      %c0_18 = arith.constant 0 : index
      %43 = vector.load %arg5[%c0_17, %c0_18] : memref<1x1xf32, #tpu.memory_space<vmem>>, vector<1x1xf32>
      %cst_19 = arith.constant 5.000000e-01 : f32
      %44 = vector.broadcast %cst_19 : f32 to vector<1x1xf32>
      %45 = arith.mulf %44, %43 : vector<1x1xf32>
      %cst_20 = arith.constant 9.000000e+02 : f32
      %46 = vector.broadcast %cst_20 : f32 to vector<1x1xf32>
      %47 = arith.addf %45, %46 : vector<1x1xf32>
      %cst_21 = arith.constant 1.000000e-03 : f32
      %48 = vector.broadcast %cst_21 : f32 to vector<1x1xf32>
      %49 = arith.mulf %48, %47 : vector<1x1xf32>
      %50 = arith.addf %42, %49 : vector<1x1xf32>
      %cst_22 = arith.constant 1.250000e-01 : f32
      %51 = vector.broadcast %cst_22 : f32 to vector<1x1xf32>
      %52 = arith.mulf %50, %51 : vector<1x1xf32>
      %c0_23 = arith.constant 0 : index
      %c0_24 = arith.constant 0 : index
      %53 = vector.load %arg5[%c0_23, %c0_24] : memref<1x1xf32, #tpu.memory_space<vmem>>, vector<1x1xf32>
      tpu.vector_store %arg5[%c0_23, %c0_24], %52 {strides = array<i32>} : memref<1x1xf32, #tpu.memory_space<vmem>>, vector<1x1xf32>,
    } else {
    }
    return
  }
  func.func @transform_0(%arg0: i32) -> (i32, i32) {
    %c0_i32 = arith.constant 0 : i32
    %c0_i32_0 = arith.constant 0 : i32
    %c0_i32_1 = arith.constant 0 : i32
    return %c0_i32, %c0_i32_0 : i32, i32
  }
  func.func @transform_1(%arg0: i32) -> (i32, i32) {
    %c0_i32 = arith.constant 0 : i32
    %c0_i32_0 = arith.constant 0 : i32
    %c0_i32_1 = arith.constant 0 : i32
    return %c0_i32, %c0_i32_0 : i32, i32
  }
  func.func @transform_2(%arg0: i32) -> (i32, i32) {
    %c0_i32 = arith.constant 0 : i32
    %c0_i32_0 = arith.constant 0 : i32
    %c0_i32_1 = arith.constant 0 : i32
    return %c0_i32, %c0_i32_0 : i32, i32
  }
  func.func @transform_3(%arg0: i32) -> (i32, i32) {
    %c0_i32 = arith.constant 0 : i32
    %c0_i32_0 = arith.constant 0 : i32
    return %arg0, %c0_i32 : i32, i32
  }
  func.func @transform_4(%arg0: i32) -> (i32, i32) {
    %c0_i32 = arith.constant 0 : i32
    %c0_i32_0 = arith.constant 0 : i32
    %c0_i32_1 = arith.constant 0 : i32
    return %c0_i32, %c0_i32_0 : i32, i32
  }
}

</mosaic_0001>

<bundles_post_ra>
// kernel: tpu_custom_call.1
= control target key start
LH: loop header
LB: loop body
LE: loop exit
PB: predicated region body
PF: predicated region fallthrough
CT: control target
= control target key end

     0   :  { %9 = vsyncpa [#allocation3], 0  ;;  %s253_s0 = inlined_call_operand.vmem [shape: s32[8,1], index: 0, kind: input, shape index: {}]   ;;  %s254_s1 = inlined_call_operand.vmem [shape: f32[8,16], index: 1, kind: input, shape index: {}]   ;;  %s255_s2 = inlined_call_operand.vmem [shape: f32[1,16], index: 2, kind: input, shape index: {}]   ;;  %s256_s3 = inlined_call_operand.hbm [shape: f32[16,128], index: 3, kind: input, shape index: {}]   ;;  %s257_s4 = inlined_call_operand.hbm [shape: f32[1,1], index: 4, kind: output, shape index: {}]  }
   0x1   :  { %10 = vsyncpa [#allocation4], 0  ;;  %s21_s17 = sshll.u32 %s256_s3, 4  ;;  %s201_s18 = smov [#allocation2]   ;;  %s22_s17 = int_to_ptr.hbm [resolvable:$true] %s21_s17 }
   0x2   :  { %s23_s19 = sshll.u32 %s201_s18, 4  ;;  %s202_s20 = smov 128   ;;  %s24_s19 = int_to_ptr.vmem [resolvable:$true] %s23_s19 }
   0x3   :  { %s203_s21 = smov 8  }
   0x4   :  { %29 = dma.hbm_to_vmem [thread:$0]  %s22_s17, 256, %s24_s19, [#allocation3], %s202_s20, %s202_s20, %s203_s21  }
   0x5   :  { %197 = dma.done.wait [#allocation3], 256  }
   0x6   :  { %198 = vsyncadd [#allocation3], 4294967040  ;;  %vm77_vm0 = vcmask 130048   ;;  %v62_v0 = vld [vmem:[%s254_s1] sm:$0xff]  ;;  %v204_v3 = vmov 0   ;;  %v41_v8 = vld [vmem:[#allocation2 + $0x8] sm:$0xff]  ;;  %v65_v15 = vlaneseq }
   0x7   :  { %v78_v1 = vsel %vm77_vm0, %v62_v0, -inf  ;;  %v63_v2 = vld [vmem:[%s253_s0] sm:$0xff]  ;;  %138 = vset.pattern.permute.xlu1 %v204_v3  ;;  %139 = vset.pattern.permute.xlu0 %v204_v3  ;;  %vm38_vm1 = vcmask 0   ;;  %v205_v14 = vmov 0.0   ;;  %s206_s26 = smov [#allocation5]   ;;  %s117_s30 = sshll.u32 %s257_s4, 4  ;;  %s118_s30 = int_to_ptr.hbm [resolvable:$true] %s117_s30 }
   0x8   :  { %79 = vmax.xlane.f32.xlu0 %v78_v1  ;;  %68 = vperm.xlu1 %138, %v63_v2   ;;  %v40_v7 = vld [vmem:[#allocation2] sm:$0xff]  ;;  %39 = vst.msk [vmem:[#allocation5] sm:$0x1] %vm38_vm1, %v205_v14  ;;  %v66_v17 = vand.u32 127, %v65_v15  ;;  %s115_s27 = sshll.u32 %s206_s26, 4  ;;  %s116_s27 = int_to_ptr.vmem [resolvable:$true] %s115_s27 }
   0x9   :  { %v140_v19 = vld [vmem:[%s255_s2] ss:$0 sm:$0xff] }
   0xf   :  { %v42_v35 = vld [vmem:[#allocation5] sm:$0x1] }
  0x7a   :  { %v69_v18 = vpop.permute.xlu1 %68 }
  0x7b   :  { %v80_v4 = vpop.xlane.xlu0 %79  ;;  %vm70_vm2 = vcmp.eq.s32.totalorder %v66_v17, %v69_v18 }
  0x7c   :  { %v81_v5 = vsub.f32 %v62_v0, %v80_v4  ;;  %v127_v21 = vsel %vm70_vm2, 1.0, %v205_v14 }
  0x7d   :  { %v76_v24 = vmul.f32 %v140_v19, %v127_v21 }
  0x7e   :  { %v82_v6 = vmul.f32 1.442695, %v81_v5 }
  0x80   :  { %141 = vpow2.f32 %v82_v6 }
  0x81   :  { %143 = vtanh.f32 %v40_v7 }
  0x82   :  { %145 = vtanh.f32 %v41_v8 }
  0x86   :  { %v142_v9 = vpop.eup %141 }
  0x87   :  { %v84_v10 = vsel %vm77_vm0, %v142_v9, 0.0  ;;  %v144_v11 = vpop.eup %143 }
  0x88   :  { %85 = vadd.xlane.f32.xlu0 %v84_v10  ;;  %v146_v12 = vpop.eup %145 }
  0x89   :  { %v45_v13 = vadd.f32 %v146_v12, %v144_v11 }
  0x8b   :  { %46 = vadd.xlane.f32.xlu1 %v45_v13 }
  0xfb   :  { %v86_v16 = vpop.xlane.xlu0 %85 }
  0xfc   :  { %147 = vlog2.f32 %v86_v16 }
  0xfe   :  { %v47_v26 = vpop.xlane.xlu1 %46 }
  0xff   :  { %v48_v27 = vrot.slane %v47_v26, 4 }
 0x101   :  { %v49_v29 = vadd.f32 %v48_v27, %v47_v26 }
 0x102   :  { %v148_v20 = vpop.eup %147 }
 0x103   :  { %v88_v22 = vmul.f32 0.6931472, %v148_v20  ;;  %v50_v31 = vrot.slane %v49_v29, 2 }
 0x105   :  { %v89_v23 = vadd.f32 %v88_v22, %v80_v4  ;;  %v51_v32 = vadd.f32 %v50_v31, %v49_v29 }
 0x107   :  { %v90_v25 = vsub.f32 %v89_v23, %v62_v0  ;;  %v52_v33 = vrot.slane %v51_v32, 1 }
 0x109   :  { %v91_v28 = vmul.f32 %v90_v25, %v76_v24  ;;  %v53_v34 = vadd.f32 %v52_v33, %v51_v32 }
 0x10b   :  { %v92_v30 = vsel %vm77_vm0, %v91_v28, 0.0  ;;  %128 = vpush %v53_v34 }
 0x10c   :  { %93 = vadd.xlane.f32.xlu2 %v92_v30 }
 0x13c   :  { %s129_s3 = spop %128 }
 0x13d   :  { %v55_v36 = vstv %s129_s3 }
 0x13e   :  { %v56_v37 = vadd.f32 %v55_v36, %v42_v35 }
 0x140   :  { %58 = vst.msk [vmem:[#allocation5] sm:$0x1] %vm38_vm1, %v56_v37 }
 0x147   :  { %v103_v45 = vld [vmem:[#allocation5] sm:$0x1] }
 0x148   :  { %v104_v46 = vmul.f32 0.5, %v103_v45 }
 0x14a   :  { %v105_v47 = vadd.f32 900.0, %v104_v46 }
 0x14c   :  { %v106_v48 = vmul.f32 0.001, %v105_v47 }
 0x17f   :  { %v94_v38 = vpop.xlane.xlu2 %93 }
 0x180   :  { %v95_v39 = vrot.slane %v94_v38, 4 }
 0x182   :  { %v96_v40 = vadd.f32 %v95_v39, %v94_v38 }
 0x184   :  { %v97_v41 = vrot.slane %v96_v40, 2 }
 0x186   :  { %v98_v42 = vadd.f32 %v97_v41, %v96_v40 }
 0x188   :  { %v99_v43 = vrot.slane %v98_v42, 1 }
 0x18a   :  { %v100_v44 = vadd.f32 %v99_v43, %v98_v42 }
 0x18c   :  { %130 = vpush %v100_v44 }
 0x1bd   :  { %s131_s2 = spop %130 }
 0x1be   :  { %v102_v49 = vstv %s131_s2 }
 0x1bf   :  { %v107_v50 = vadd.f32 %v106_v48, %v102_v49 }
 0x1c1   :  { %v108_v51 = vmul.f32 0.125, %v107_v50 }
 0x1c3   :  { %109 = vst.msk [vmem:[#allocation5] sm:$0x1] %vm38_vm1, %v108_v51 }
 0x1c4   :  { %120 = dma.vmem_to_hbm [thread:$0]  %s116_s27, 16, %s118_s30, [#allocation4]  }
 0x1c5   :  { %199 = dma.done.wait [#allocation4], 16  }
 0x1c6   :  { %200 = vsyncadd [#allocation4], 4294967280 }
 0x1c7   :  { %125 = vsyncpa [#allocation3], 1 }
 0x1c8   :  { %126 = vsyncpa [#allocation4], 1 }

</bundles_post_ra>
